<compile_context>
chip_gen: v5e
topology: v5e:2x2
jax: 0.10.0
libtpu: 0.0.40
codegen_flags: <defaults>
</compile_context>

<pallas_src>
import functools

import jax
import jax.numpy as jnp
from jax.experimental import pallas as pl
from jax.experimental.pallas import tpu as pltpu

LANES = 128
SUBLANES = 8
DEFAULT_BLOCK_ROWS = 1024   # 1024 x 128 f32 = 512 KiB per stream per buffer


# ------------------------------ Pallas kernel --------------------------------
def _masked_snr_loss_kernel(pred_ref, target_ref, mask_ref,
                            loss_out_ref, mask_out_ref,
                            *, eps, n, block_rows, blocks_per_core):
    core = pl.program_id(0)   # "parallel" axis (both TCs on v7x)
    step = pl.program_id(1)   # "arbitrary" reduction axis over row blocks

    # Each core's resident output block doubles as its partial accumulator.
    @pl.when(step == 0)
    def _():
        loss_out_ref[...] = jnp.zeros_like(loss_out_ref)
        mask_out_ref[...] = jnp.zeros_like(mask_out_ref)

    # Upcast narrow native dtypes (bf16 / int8 / bool) in-kernel; HBM traffic
    # stays in the native width.
    p = pred_ref[...].astype(jnp.float32)
    t = target_ref[...].astype(jnp.float32)
    m = mask_ref[...].astype(jnp.float32)

    # In-kernel validity (replaces the old `valid` HBM stream).  n, block sizes
    # are compile-time Python ints.  Split row/lane comparison avoids computing
    # a flat element index, so there is no int32 overflow for huge tensors.
    block_idx = core * blocks_per_core + step        # UNclamped, grid-derived
    row0 = block_idx * block_rows
    row_iota = jax.lax.broadcasted_iota(jnp.int32, (block_rows, LANES), 0)
    lane_iota = jax.lax.broadcasted_iota(jnp.int32, (block_rows, LANES), 1)
    grow = row0 + row_iota                           # global row index
    full_rows = n // LANES
    tail = n % LANES
    valid = (grow < full_rows) | ((grow == full_rows) & (lane_iota < tail))

    diff = p - t
    mse = diff * diff
    snr = (t * t) / (mse + eps)
    loss = -jnp.log(snr * m + eps)                   # EUP transcendental

    # where (not multiply): garbage in ragged/phantom blocks may be NaN/Inf.
    loss_out_ref[...] += jnp.where(valid, loss, 0.0)
    mask_out_ref[...] += jnp.where(valid, m, 0.0)


# ------------------------------ wrapper ---------------------------------------
def masked_snr_loss(pred, target, mask, eps=1e-8, block_rows=DEFAULT_BLOCK_ROWS):
    """Scalar loss, identical semantics to the PyTorch MaskedSNRLoss.forward."""
    n = pred.size

    # Lane-dense layout: flatten -> pad only up to a sublane-aligned row count.
    rows = pl.cdiv(n, LANES)
    rows = pl.cdiv(rows, SUBLANES) * SUBLANES
    block_rows = min(block_rows, rows)               # full-dim block for tiny inputs
    padded = rows * LANES

    def prep(a):
        a = a.reshape(-1)                            # keep native dtype
        if padded != n:
            a = jnp.pad(a, (0, padded - n))
        return a.reshape(rows, LANES)

    p2, t2, m2 = prep(pred), prep(target), prep(mask)

    num_blocks = pl.cdiv(rows, block_rows)
    # v7x has 2 TensorCores; a 2-wide "parallel" axis uses both.  Harmless on
    # single-TC v5e/v6e.  Skip the split when there is only one block of work.
    num_cores = 2 if num_blocks >= 2 else 1
    blocks_per_core = pl.cdiv(num_blocks, num_cores)

    def in_idx(c, i):
        # Clamp so a phantom block on core 1 (odd num_blocks) stays in bounds;
        # its contribution is zeroed by the in-kernel validity mask anyway.
        return (jnp.minimum(c * blocks_per_core + i, num_blocks - 1), 0)

    tile = pl.BlockSpec((block_rows, LANES), in_idx)
    # Per-core resident accumulator slab (lane-dense, (8,128)-aligned stores).
    out_spec = pl.BlockSpec((block_rows, LANES), lambda c, i: (c, 0))

    loss_parts, mask_parts = pl.pallas_call(
        functools.partial(_masked_snr_loss_kernel, eps=eps, n=n,
                          block_rows=block_rows, blocks_per_core=blocks_per_core),
        out_shape=(jax.ShapeDtypeStruct((num_cores * block_rows, LANES), jnp.float32),
                   jax.ShapeDtypeStruct((num_cores * block_rows, LANES), jnp.float32)),
        grid=(num_cores, blocks_per_core),
        in_specs=[tile, tile, tile],
        out_specs=(out_spec, out_spec),
        compiler_params=pltpu.CompilerParams(
            # core axis is independent, row-block axis is the reduction.
            dimension_semantics=("parallel", "arbitrary"),
        ),
    )(p2, t2, m2)

    # Tiny final reduction (a few KB) + division done wrapper-side.
    # Note: mask.sum() == 0 -> inf/NaN, same as the PyTorch reference.
    return jnp.sum(loss_parts) / jnp.sum(mask_parts)


# ----------------------------- reference (pure JAX) ----------------------------
def masked_snr_loss_ref(pred, target, mask, eps=1e-8):
    mse = (pred - target) ** 2
    snr = target ** 2 / (mse + eps)
    masked_snr = snr * mask
    loss = -jnp.log(masked_snr + eps)
    return loss.sum() / mask.sum()


if __name__ == "__main__":
    key = jax.random.PRNGKey(0)
    kp, kt, km, kp2, kt2, km2 = jax.random.split(key, 6)

    # Test 1: small (batch, channels, H, W) signal tensor -> single block path.
    shape = (2, 4, 16, 16)
    pred = jax.random.normal(kp, shape, jnp.float32)
    target = jax.random.normal(kt, shape, jnp.float32)
    mask = jax.random.bernoulli(km, 0.5, shape).astype(jnp.float32)

    out = jax.block_until_ready(jax.jit(masked_snr_loss)(pred, target, mask))
    ref = masked_snr_loss_ref(pred, target, mask)
    assert out.shape == ()
    assert jnp.isfinite(out), "non-finite loss"
    assert jnp.allclose(out, ref, atol=1e-3, rtol=1e-3), (out, ref)

    # Test 2: ragged flat tensor -> exercises the 2-core split, the partial
    # tail block and the lane tail mask.
    n2 = 150_000
    pred2 = jax.random.normal(kp2, (n2,), jnp.float32)
    target2 = jax.random.normal(kt2, (n2,), jnp.float32)
    mask2 = jax.random.bernoulli(km2, 0.5, (n2,)).astype(jnp.float32)

    out2 = jax.block_until_ready(jax.jit(masked_snr_loss)(pred2, target2, mask2))
    ref2 = masked_snr_loss_ref(pred2, target2, mask2)
    assert jnp.isfinite(out2), "non-finite loss (test 2)"
    assert jnp.allclose(out2, ref2, atol=1e-3, rtol=1e-3), (out2, ref2)

    print("KERNEL_OK")
</pallas_src>

<mosaic_0001>
module attributes {stable_mosaic.version = 11 : i64} {
  func.func @_masked_snr_loss_kernel(%arg0: i32, %arg1: i32, %arg2: memref<16x128xf32, #tpu.memory_space<vmem>>, %arg3: memref<16x128xf32, #tpu.memory_space<vmem>>, %arg4: memref<16x128xf32, #tpu.memory_space<vmem>>, %arg5: memref<16x128xf32, #tpu.memory_space<vmem>>, %arg6: memref<16x128xf32, #tpu.memory_space<vmem>>) attributes {dimension_semantics = [#tpu.dimension_semantics<parallel>, #tpu.dimension_semantics<arbitrary>], iteration_bounds = array<i64: 1, 1>, scalar_prefetch = 0 : i64, scratch_operands = 0 : i64, tpu.core_type = #tpu.core_type<tc>, window_params = [{transform_indices = @transform_0, window_bounds = array<i64: 16, 128>}, {transform_indices = @transform_1, window_bounds = array<i64: 16, 128>}, {transform_indices = @transform_2, window_bounds = array<i64: 16, 128>}, {transform_indices = @transform_3, window_bounds = array<i64: 16, 128>}, {transform_indices = @transform_4, window_bounds = array<i64: 16, 128>}]} {
    %c0_i32 = arith.constant 0 : i32
    %0 = arith.cmpi eq, %arg1, %c0_i32 : i32
    %1 = arith.extui %0 : i1 to i32
    %c0_i32_0 = arith.constant 0 : i32
    %2 = arith.cmpi ne, %1, %c0_i32_0 : i32
    scf.if %2 {
      %cst_21 = arith.constant 0.000000e+00 : f32
      %43 = vector.broadcast %cst_21 : f32 to vector<16x128xf32>
      %c0_22 = arith.constant 0 : index
      %c0_23 = arith.constant 0 : index
      %44 = vector.load %arg5[%c0_22, %c0_23] : memref<16x128xf32, #tpu.memory_space<vmem>>, vector<16x128xf32>
      tpu.vector_store %arg5[%c0_22, %c0_23], %43 {strides = array<i32>} : memref<16x128xf32, #tpu.memory_space<vmem>>, vector<16x128xf32>,
      %cst_24 = arith.constant 0.000000e+00 : f32
      %45 = vector.broadcast %cst_24 : f32 to vector<16x128xf32>
      %c0_25 = arith.constant 0 : index
      %c0_26 = arith.constant 0 : index
      %46 = vector.load %arg6[%c0_25, %c0_26] : memref<16x128xf32, #tpu.memory_space<vmem>>, vector<16x128xf32>
      tpu.vector_store %arg6[%c0_25, %c0_26], %45 {strides = array<i32>} : memref<16x128xf32, #tpu.memory_space<vmem>>, vector<16x128xf32>,
    } else {
    }
    %c0 = arith.constant 0 : index
    %c0_1 = arith.constant 0 : index
    %3 = vector.load %arg2[%c0, %c0_1] : memref<16x128xf32, #tpu.memory_space<vmem>>, vector<16x128xf32>
    %c0_2 = arith.constant 0 : index
    %c0_3 = arith.constant 0 : index
    %4 = vector.load %arg3[%c0_2, %c0_3] : memref<16x128xf32, #tpu.memory_space<vmem>>, vector<16x128xf32>
    %c0_4 = arith.constant 0 : index
    %c0_5 = arith.constant 0 : index
    %5 = vector.load %arg4[%c0_4, %c0_5] : memref<16x128xf32, #tpu.memory_space<vmem>>, vector<16x128xf32>
    %c1_i32 = arith.constant 1 : i32
    %6 = arith.muli %arg0, %c1_i32 : i32
    %7 = arith.addi %6, %arg1 : i32
    %c16_i32 = arith.constant 16 : i32
    %8 = arith.muli %7, %c16_i32 : i32
    %9 = tpu.iota {dimensions = array<i32: 0>} : vector<16x128xi32>
    %10 = tpu.iota {dimensions = array<i32: 1>} : vector<16x128xi32>
    %11 = vector.broadcast %8 : i32 to vector<16x128xi32>
    %12 = arith.addi %11, %9 : vector<16x128xi32>
    %c16_i32_6 = arith.constant 16 : i32
    %13 = vector.broadcast %c16_i32_6 : i32 to vector<16x128xi32>
    %14 = arith.cmpi slt, %12, %13 : vector<16x128xi32>
    %c16_i32_7 = arith.constant 16 : i32
    %15 = vector.broadcast %c16_i32_7 : i32 to vector<16x128xi32>
    %16 = arith.cmpi eq, %12, %15 : vector<16x128xi32>
    %c0_i32_8 = arith.constant 0 : i32
    %17 = vector.broadcast %c0_i32_8 : i32 to vector<16x128xi32>
    %18 = arith.cmpi slt, %10, %17 : vector<16x128xi32>
    %19 = arith.andi %16, %18 : vector<16x128xi1>
    %20 = arith.ori %14, %19 : vector<16x128xi1>
    %21 = arith.subf %3, %4 : vector<16x128xf32>
    %22 = arith.mulf %21, %21 : vector<16x128xf32>
    %23 = arith.mulf %4, %4 : vector<16x128xf32>
    %cst = arith.constant 9.99999993E-9 : f32
    %24 = vector.broadcast %cst : f32 to vector<16x128xf32>
    %25 = arith.addf %22, %24 : vector<16x128xf32>
    %26 = arith.divf %23, %25 : vector<16x128xf32>
    %27 = arith.mulf %26, %5 : vector<16x128xf32>
    %cst_9 = arith.constant 9.99999993E-9 : f32
    %28 = vector.broadcast %cst_9 : f32 to vector<16x128xf32>
    %29 = arith.addf %27, %28 : vector<16x128xf32>
    %30 = math.log %29 : vector<16x128xf32>
    %cst_10 = arith.constant 0.000000e+00 : f32
    %31 = vector.broadcast %cst_10 : f32 to vector<16x128xf32>
    %32 = arith.subf %31, %30 : vector<16x128xf32>
    %c0_11 = arith.constant 0 : index
    %c0_12 = arith.constant 0 : index
    %33 = vector.load %arg5[%c0_11, %c0_12] : memref<16x128xf32, #tpu.memory_space<vmem>>, vector<16x128xf32>
    %cst_13 = arith.constant 0.000000e+00 : f32
    %34 = vector.broadcast %cst_13 : f32 to vector<16x128xf32>
    %35 = arith.select %20, %32, %34 : vector<16x128xi1>, vector<16x128xf32>
    %36 = arith.addf %33, %35 : vector<16x128xf32>
    %c0_14 = arith.constant 0 : index
    %c0_15 = arith.constant 0 : index
    %37 = vector.load %arg5[%c0_14, %c0_15] : memref<16x128xf32, #tpu.memory_space<vmem>>, vector<16x128xf32>
    tpu.vector_store %arg5[%c0_14, %c0_15], %36 {strides = array<i32>} : memref<16x128xf32, #tpu.memory_space<vmem>>, vector<16x128xf32>,
    %c0_16 = arith.constant 0 : index
    %c0_17 = arith.constant 0 : index
    %38 = vector.load %arg6[%c0_16, %c0_17] : memref<16x128xf32, #tpu.memory_space<vmem>>, vector<16x128xf32>
    %cst_18 = arith.constant 0.000000e+00 : f32
    %39 = vector.broadcast %cst_18 : f32 to vector<16x128xf32>
    %40 = arith.select %20, %5, %39 : vector<16x128xi1>, vector<16x128xf32>
    %41 = arith.addf %38, %40 : vector<16x128xf32>
    %c0_19 = arith.constant 0 : index
    %c0_20 = arith.constant 0 : index
    %42 = vector.load %arg6[%c0_19, %c0_20] : memref<16x128xf32, #tpu.memory_space<vmem>>, vector<16x128xf32>
    tpu.vector_store %arg6[%c0_19, %c0_20], %41 {strides = array<i32>} : memref<16x128xf32, #tpu.memory_space<vmem>>, vector<16x128xf32>,
    return
  }
  func.func @transform_0(%arg0: i32, %arg1: i32) -> (i32, i32) {
    %c1_i32 = arith.constant 1 : i32
    %0 = arith.muli %arg0, %c1_i32 : i32
    %1 = arith.addi %0, %arg1 : i32
    %c0_i32 = arith.constant 0 : i32
    %2 = arith.minsi %1, %c0_i32 : i32
    %c0_i32_0 = arith.constant 0 : i32
    %c0_i32_1 = arith.constant 0 : i32
    return %2, %c0_i32_0 : i32, i32
  }
  func.func @transform_1(%arg0: i32, %arg1: i32) -> (i32, i32) {
    %c1_i32 = arith.constant 1 : i32
    %0 = arith.muli %arg0, %c1_i32 : i32
    %1 = arith.addi %0, %arg1 : i32
    %c0_i32 = arith.constant 0 : i32
    %2 = arith.minsi %1, %c0_i32 : i32
    %c0_i32_0 = arith.constant 0 : i32
    %c0_i32_1 = arith.constant 0 : i32
    return %2, %c0_i32_0 : i32, i32
  }
  func.func @transform_2(%arg0: i32, %arg1: i32) -> (i32, i32) {
    %c1_i32 = arith.constant 1 : i32
    %0 = arith.muli %arg0, %c1_i32 : i32
    %1 = arith.addi %0, %arg1 : i32
    %c0_i32 = arith.constant 0 : i32
    %2 = arith.minsi %1, %c0_i32 : i32
    %c0_i32_0 = arith.constant 0 : i32
    %c0_i32_1 = arith.constant 0 : i32
    return %2, %c0_i32_0 : i32, i32
  }
  func.func @transform_3(%arg0: i32, %arg1: i32) -> (i32, i32) {
    %c0_i32 = arith.constant 0 : i32
    %c0_i32_0 = arith.constant 0 : i32
    return %arg0, %c0_i32 : i32, i32
  }
  func.func @transform_4(%arg0: i32, %arg1: i32) -> (i32, i32) {
    %c0_i32 = arith.constant 0 : i32
    %c0_i32_0 = arith.constant 0 : i32
    return %arg0, %c0_i32 : i32, i32
  }
}

</mosaic_0001>

<bundles_post_ra>
// kernel: masked_snr_loss.1
= control target key start
LH: loop header
LB: loop body
LE: loop exit
PB: predicated region body
PF: predicated region fallthrough
CT: control target
= control target key end

     0   :  { %s299_s0 = inlined_call_operand.vmem [shape: f32[16,128], index: 0, kind: input, shape index: {}]   ;;  %s300_s1 = inlined_call_operand.vmem [shape: f32[16,128], index: 1, kind: input, shape index: {}]   ;;  %s301_s2 = inlined_call_operand.vmem [shape: f32[16,128], index: 2, kind: input, shape index: {}]   ;;  %s302_s4 = inlined_call_operand.vmem [shape: f32[16,128], index: 4, kind: output, shape index: {1}]   ;;  %s303_s3 = inlined_call_operand.vmem [shape: f32[16,128], index: 3, kind: output, shape index: {0}]  }
   0x1   :  { %v120_v0 = vld [vmem:[%s299_s0] sm:$0xff]  ;;  %v121_v3 = vld [vmem:[%s299_s0 + $0x8] sm:$0xff] }
   0x2   :  { %v122_v1 = vld [vmem:[%s300_s1] sm:$0xff]  ;;  %v123_v4 = vld [vmem:[%s300_s1 + $0x8] sm:$0xff] }
   0x3   :  { %v145_v2 = vsub.f32 %v120_v0, %v122_v1  ;;  %v146_v5 = vsub.f32 %v121_v3, %v123_v4  ;;  %v124_v10 = vld [vmem:[%s301_s2] sm:$0xff]  ;;  %v125_v11 = vld [vmem:[%s301_s2 + $0x8] sm:$0xff]  ;;  %v149_v25 = vmul.f32 %v122_v1, %v122_v1  ;;  %v150_v28 = vmul.f32 %v123_v4, %v123_v4 }
   0x4   :  { %207 = vst [vmem:[%s302_s4] sm:$0xff] %v124_v10 }
   0x5   :  { %v147_v6 = vmul.f32 %v145_v2, %v145_v2  ;;  %v148_v7 = vmul.f32 %v146_v5, %v146_v5  ;;  %208 = vst [vmem:[%s302_s4 + $0x8] sm:$0xff] %v125_v11 }
   0x7   :  { %v151_v8 = vadd.f32 1e-08, %v147_v6  ;;  %v152_v9 = vadd.f32 1e-08, %v148_v7 }
   0x9   :  { %236 = vrcp.f32 %v151_v8  ;;  %vm158_vm0 = vweird.f32 %v151_v8  ;;  %v164_v15 = vand.u32 2147483648, %v151_v8  ;;  %v162_v18 = vand.u32 2147483647, %v151_v8 }
   0xa   :  { %238 = vrcp.f32 %v152_v9  ;;  %v179_v19 = vand.u32 2147483648, %v152_v9  ;;  %vm173_vm2 = vweird.f32 %v152_v9  ;;  %v177_v21 = vand.u32 2147483647, %v152_v9 }
   0xb   :  { %v165_v23 = vor.u32 1.1754944e-38, %v164_v15  ;;  %vm163_vm5 = vcmp.eq.f32.partialorder %v162_v18, 8.507059e+37 }
   0xc   :  { %v180_v27 = vor.u32 1.1754944e-38, %v179_v19  ;;  %vm178_vm7 = vcmp.eq.f32.partialorder %v177_v21, 8.507059e+37 }
   0xf   :  { %v237_v12 = vpop.eup %236 }
  0x10   :  { %v239_v13 = vpop.eup %238  ;;  %v154_v14 = vmul.f32 %v237_v12, %v151_v8  ;;  %vm159_vm1 = vweird.f32 %v237_v12 }
  0x11   :  { %v169_v16 = vmul.f32 %v239_v13, %v152_v9  ;;  %vm174_vm3 = vweird.f32 %v239_v13  ;;  %vm160_vm4 = vmor %vm158_vm0, %vm159_vm1 }
  0x12   :  { %v155_v17 = vsub.f32 1.0, %v154_v14  ;;  %vm175_vm6 = vmor %vm173_vm2, %vm174_vm3 }
  0x13   :  { %v170_v20 = vsub.f32 1.0, %v169_v16 }
  0x14   :  { %v156_v22 = vmul.f32 %v237_v12, %v155_v17 }
  0x15   :  { %v171_v24 = vmul.f32 %v239_v13, %v170_v20 }
  0x16   :  { %v157_v26 = vadd.f32 %v237_v12, %v156_v22 }
  0x17   :  { %v172_v29 = vadd.f32 %v239_v13, %v171_v24 }
  0x18   :  { %v161_v30 = vsel %vm160_vm4, %v237_v12, %v157_v26 }
  0x19   :  { %v166_v31 = vsel %vm163_vm5, %v165_v23, %v161_v30  ;;  %v176_v32 = vsel %vm175_vm6, %v239_v13, %v172_v29 }
  0x1a   :  { %v167_v33 = vmul.f32 %v166_v31, %v149_v25  ;;  %v181_v34 = vsel %vm178_vm7, %v180_v27, %v176_v32 }
  0x1b   :  { %v182_v35 = vmul.f32 %v181_v34, %v150_v28 }
  0x1c   :  { %v183_v36 = vmul.f32 %v167_v33, %v124_v10 }
  0x1d   :  { %v184_v37 = vmul.f32 %v182_v35, %v125_v11 }
  0x1e   :  { %v185_v38 = vadd.f32 1e-08, %v183_v36 }
  0x1f   :  { %v186_v39 = vadd.f32 1e-08, %v184_v37 }
  0x20   :  { %240 = vlog2.f32 %v185_v38 }
  0x21   :  { %242 = vlog2.f32 %v186_v39 }
  0x26   :  { %v241_v40 = vpop.eup %240 }
  0x27   :  { %v243_v41 = vpop.eup %242  ;;  %v188_v42 = vmul.f32 0.6931472, %v241_v40 }
  0x28   :  { %v190_v43 = vmul.f32 0.6931472, %v243_v41 }
  0x29   :  { %v191_v44 = vsub.f32 0.0, %v188_v42 }
  0x2a   :  { %v192_v45 = vsub.f32 0.0, %v190_v43 }
  0x2b   :  { %199 = vst [vmem:[%s303_s3] sm:$0xff] %v191_v44 }
  0x2c   :  { %200 = vst [vmem:[%s303_s3 + $0x8] sm:$0xff] %v192_v45 }

</bundles_post_ra>
